<compile_context>
chip_gen: v6e
topology: v6e:2x2x1
jax: 0.10.0
libtpu: 0.0.40
codegen_flags: <defaults>
</compile_context>

<pallas_src>
import math

import jax
import jax.numpy as jnp
from jax.experimental import pallas as pl
from jax.experimental.pallas import tpu as pltpu


# ----------------------------------------------------------------------------
# Fused Pallas kernel: masked mean over rows -> ReLU -> Linear(512, 2)
# ----------------------------------------------------------------------------
def _svfeature_kernel(x_ref, w_ref, b_ref, o_ref):
    # x: (TB, C, F) native dtype, w: (N, F), b: (1, N), o: (TB, N) f32
    x = x_ref[...].astype(jnp.float32)                     # cast at load; f32 math

    # SVFeatureBlock('mean'): drop rows whose sum is exactly 0, mean the rest.
    row_sums = jnp.sum(x, axis=2, keepdims=True)           # (TB, C, 1)  XLU lane-reduce
    mask = (row_sums != 0.0).astype(jnp.float32)           # (TB, C, 1)
    cnt = jnp.sum(mask, axis=1)                            # (TB, 1)
    feat = jnp.sum(x * mask, axis=1) / cnt                 # (TB, F); cnt==0 -> NaN (== PyTorch)

    # nn.Sequential(nn.ReLU(), nn.Linear(512, 2)), FC on the VPU/XLU (N=2, so
    # the MXU buys nothing and would force a padded weight fill).
    feat = jnp.maximum(feat, 0.0)                          # (TB, F)
    w = w_ref[...].astype(jnp.float32)                     # (N, F) native layout
    y = jnp.sum(feat[:, None, :] * w[None, :, :], axis=-1)  # (TB, N)
    o_ref[...] = y + b_ref[...]                            # + bias, lane-broadcast


def _pick_block_b(B, C, F, itemsize):
    """Batch tile: whole batch when tiny, else a multiple of 8 sized so the
    double-buffered input tile stays well inside v7x's 64 MiB VMEM."""
    if B <= 8:
        return B
    budget = 24 * 1024 * 1024                               # ~24 MiB for 2x input tile
    per_row = 2 * C * F * itemsize
    tb = max(8, min(B, budget // max(per_row, 1)))
    tb -= tb % 8                                            # keep (8,128)-friendly
    return max(8, tb)


def svfeature_forward(params, sv, *, block_b=None):
    """sv: (B, C, 512) f32/bf16 -> (B, 2) f32."""
    B, C, F = sv.shape
    w = params["fc_w"]                                      # (2, F)  native PyTorch layout
    b = params["fc_b"]                                      # (2,)
    N = w.shape[0]
    b2 = b.reshape(1, N).astype(jnp.float32)                # 8-byte reshape, no padding

    tb = block_b if block_b is not None else _pick_block_b(B, C, F, sv.dtype.itemsize)
    grid = (pl.cdiv(B, tb),)

    return pl.pallas_call(
        _svfeature_kernel,
        out_shape=jax.ShapeDtypeStruct((B, N), jnp.float32),
        grid=grid,
        in_specs=[
            pl.BlockSpec((tb, C, F), lambda i: (i, 0, 0)),   # batch-tiled input
            pl.BlockSpec((N, F), lambda i: (0, 0)),          # full weight, every step
            pl.BlockSpec((1, N), lambda i: (0, 0)),          # full bias, every step
        ],
        out_specs=pl.BlockSpec((tb, N), lambda i: (i, 0)),
        compiler_params=pltpu.CompilerParams(
            dimension_semantics=("parallel",)),              # shard batch across TCs (v7x)
    )(sv, w, b2)


# ----------------------------------------------------------------------------
# Parameter init (PyTorch nn.Linear defaults: U(-1/sqrt(fan_in), 1/sqrt(fan_in)))
# ----------------------------------------------------------------------------
def init_params(key, in_features=512, out_features=2):
    kw, kb = jax.random.split(key)
    s = 1.0 / math.sqrt(in_features)
    return {
        "fc_w": jax.random.uniform(kw, (out_features, in_features),
                                   jnp.float32, -s, s),
        "fc_b": jax.random.uniform(kb, (out_features,), jnp.float32, -s, s),
    }


# ----------------------------------------------------------------------------
# Pure-JAX reference (mirrors the PyTorch forward) for a correctness check
# ----------------------------------------------------------------------------
def _reference(params, sv):
    sv = sv.astype(jnp.float32)
    row_sums = jnp.sum(sv, axis=2, keepdims=True)
    mask = (row_sums != 0.0).astype(jnp.float32)
    cnt = jnp.sum(mask, axis=1)
    feat = jnp.sum(sv * mask, axis=1) / cnt
    feat = jnp.maximum(feat, 0.0)
    return feat @ params["fc_w"].T + params["fc_b"]


# ----------------------------------------------------------------------------
if __name__ == "__main__":
    key = jax.random.PRNGKey(0)
    kp, ksv = jax.random.split(key)
    params = init_params(kp)

    B, C, F = 2, 6, 512
    sv = jax.random.normal(ksv, (B, C, F), jnp.float32)
    # Zero out some street-view rows to exercise the non-zero-row masking
    # (each sample keeps at least one non-zero row, as in real data).
    row_mask = jnp.array([[1, 1, 0, 1, 0, 1],
                          [1, 0, 1, 1, 1, 0]], jnp.float32)
    sv = sv * row_mask[:, :, None]

    fwd = jax.jit(svfeature_forward)
    out = jax.block_until_ready(fwd(params, sv))

    assert out.shape == (B, 2) and out.dtype == jnp.float32
    ref = _reference(params, sv)
    assert jnp.allclose(out, ref, atol=1e-5, rtol=1e-5), (out, ref)
    print("KERNEL_OK")
</pallas_src>

<mosaic_0001>
module attributes {stable_mosaic.version = 11 : i64} {
  func.func @_svfeature_kernel(%arg0: i32, %arg1: memref<2x6x512xf32, #tpu.memory_space<vmem>>, %arg2: memref<2x512xf32, #tpu.memory_space<vmem>>, %arg3: memref<1x2xf32, #tpu.memory_space<vmem>>, %arg4: memref<2x2xf32, #tpu.memory_space<vmem>>) attributes {dimension_semantics = [#tpu.dimension_semantics<parallel>], iteration_bounds = array<i64: 1>, scalar_prefetch = 0 : i64, scratch_operands = 0 : i64, tpu.core_type = #tpu.core_type<tc>, window_params = [{transform_indices = @transform_0, window_bounds = array<i64: 2, 6, 512>}, {pipeline_mode = #tpu.pipeline_mode<synchronous>, transform_indices = @transform_1, window_bounds = array<i64: 2, 512>}, {pipeline_mode = #tpu.pipeline_mode<synchronous>, transform_indices = @transform_2, window_bounds = array<i64: 1, 2>}, {transform_indices = @transform_3, window_bounds = array<i64: 2, 2>}]} {
    %c0 = arith.constant 0 : index
    %c0_0 = arith.constant 0 : index
    %c0_1 = arith.constant 0 : index
    %0 = vector.load %arg1[%c0, %c0_0, %c0_1] : memref<2x6x512xf32, #tpu.memory_space<vmem>>, vector<2x6x512xf32>
    %cst = arith.constant dense<0.000000e+00> : vector<2x6xf32>
    %1 = vector.multi_reduction <add>, %0, %cst [2] : vector<2x6x512xf32> to vector<2x6xf32>
    %2 = vector.shape_cast %1 : vector<2x6xf32> to vector<2x6x1xf32>
    %cst_2 = arith.constant 0.000000e+00 : f32
    %3 = vector.broadcast %cst_2 : f32 to vector<2x6x1xf32>
    %4 = arith.cmpf one, %2, %3 : vector<2x6x1xf32>
    %5 = arith.extui %4 : vector<2x6x1xi1> to vector<2x6x1xi32>
    %6 = arith.sitofp %5 : vector<2x6x1xi32> to vector<2x6x1xf32>
    %cst_3 = arith.constant dense<0.000000e+00> : vector<2x1xf32>
    %7 = vector.multi_reduction <add>, %6, %cst_3 [1] : vector<2x6x1xf32> to vector<2x1xf32>
    %8 = vector.broadcast %6 : vector<2x6x1xf32> to vector<2x6x512xf32>
    %9 = arith.mulf %0, %8 : vector<2x6x512xf32>
    %cst_4 = arith.constant dense<0.000000e+00> : vector<2x512xf32>
    %10 = vector.multi_reduction <add>, %9, %cst_4 [1] : vector<2x6x512xf32> to vector<2x512xf32>
    %11 = vector.broadcast %7 : vector<2x1xf32> to vector<2x512xf32>
    %12 = arith.divf %10, %11 : vector<2x512xf32>
    %cst_5 = arith.constant 0.000000e+00 : f32
    %13 = vector.broadcast %cst_5 : f32 to vector<2x512xf32>
    %14 = arith.maximumf %12, %13 : vector<2x512xf32>
    %c0_6 = arith.constant 0 : index
    %c0_7 = arith.constant 0 : index
    %15 = vector.load %arg2[%c0_6, %c0_7] : memref<2x512xf32, #tpu.memory_space<vmem>>, vector<2x512xf32>
    %16 = vector.shape_cast %14 : vector<2x512xf32> to vector<2x1x512xf32>
    %17 = vector.shape_cast %15 : vector<2x512xf32> to vector<1x2x512xf32>
    %18 = vector.broadcast %16 : vector<2x1x512xf32> to vector<2x2x512xf32>
    %19 = vector.broadcast %17 : vector<1x2x512xf32> to vector<2x2x512xf32>
    %20 = arith.mulf %18, %19 : vector<2x2x512xf32>
    %cst_8 = arith.constant dense<0.000000e+00> : vector<2x2xf32>
    %21 = vector.multi_reduction <add>, %20, %cst_8 [2] : vector<2x2x512xf32> to vector<2x2xf32>
    %c0_9 = arith.constant 0 : index
    %c0_10 = arith.constant 0 : index
    %22 = vector.load %arg3[%c0_9, %c0_10] : memref<1x2xf32, #tpu.memory_space<vmem>>, vector<1x2xf32>
    %23 = vector.broadcast %22 : vector<1x2xf32> to vector<2x2xf32>
    %24 = arith.addf %21, %23 : vector<2x2xf32>
    %c0_11 = arith.constant 0 : index
    %c0_12 = arith.constant 0 : index
    %25 = vector.load %arg4[%c0_11, %c0_12] : memref<2x2xf32, #tpu.memory_space<vmem>>, vector<2x2xf32>
    tpu.vector_store %arg4[%c0_11, %c0_12], %24 {strides = array<i32>} : memref<2x2xf32, #tpu.memory_space<vmem>>, vector<2x2xf32>,
    return
  }
  func.func @transform_0(%arg0: i32) -> (i32, i32, i32) {
    %c0_i32 = arith.constant 0 : i32
    %c0_i32_0 = arith.constant 0 : i32
    %c0_i32_1 = arith.constant 0 : i32
    return %arg0, %c0_i32, %c0_i32_0 : i32, i32, i32
  }
  func.func @transform_1(%arg0: i32) -> (i32, i32) {
    %c0_i32 = arith.constant 0 : i32
    %c0_i32_0 = arith.constant 0 : i32
    %c0_i32_1 = arith.constant 0 : i32
    return %c0_i32, %c0_i32_0 : i32, i32
  }
  func.func @transform_2(%arg0: i32) -> (i32, i32) {
    %c0_i32 = arith.constant 0 : i32
    %c0_i32_0 = arith.constant 0 : i32
    %c0_i32_1 = arith.constant 0 : i32
    return %c0_i32, %c0_i32_0 : i32, i32
  }
  func.func @transform_3(%arg0: i32) -> (i32, i32) {
    %c0_i32 = arith.constant 0 : i32
    %c0_i32_0 = arith.constant 0 : i32
    return %arg0, %c0_i32 : i32, i32
  }
}

</mosaic_0001>

<bundles_post_ra>
// kernel: svfeature_forward.1
= control target key start
LH: loop header
LB: loop body
LE: loop exit
PB: predicated region body
PF: predicated region fallthrough
CT: control target
= control target key end

     0   :  { %vm23_vm0 = vcmask 1045504   ;;  %s368_s0 = inlined_call_operand.vmem [shape: f32[2,6,512], index: 0, kind: input, shape index: {}]   ;;  %s369_s1 = inlined_call_operand.vmem [shape: f32[2,512], index: 1, kind: input, shape index: {}]   ;;  %s370_s2 = inlined_call_operand.vmem [shape: f32[1,2], index: 2, kind: input, shape index: {}]   ;;  %s371_s3 = inlined_call_operand.hbm [shape: f32[2,2], index: 3, kind: output, shape index: {}]  }
   0x1   :  { %v15_v0 = vld [vmem:[%s368_s0] sm:$0x3f]  ;;  %v16_v1 = vld [vmem:[%s368_s0 + $0x8] sm:$0x3f]  ;;  %v17_v2 = vld [vmem:[%s368_s0 + $0x10] sm:$0x3f] }
   0x2   :  { %v18_v3 = vld [vmem:[%s368_s0 + $0x18] sm:$0x3f]  ;;  %v19_v4 = vld [vmem:[%s368_s0 + $0x20] sm:$0x3f]  ;;  %v24_v5 = vsel %vm23_vm0, %v15_v0, 0.0  ;;  %v25_v6 = vsel %vm23_vm0, %v16_v1, 0.0 }
   0x3   :  { %v27_v7 = vsel %vm23_vm0, %v17_v2, 0.0  ;;  %v20_v8 = vld [vmem:[%s368_s0 + $0x28] sm:$0x3f]  ;;  %v26_v9 = vadd.f32 %v25_v6, %v24_v5  ;;  %v21_v10 = vld [vmem:[%s368_s0 + $0x30] sm:$0x3f]  ;;  %v33_v12 = vsel %vm23_vm0, %v19_v4, 0.0 }
   0x4   :  { %v22_v11 = vld [vmem:[%s368_s0 + $0x38] sm:$0x3f]  ;;  %v34_v13 = vsel %vm23_vm0, %v20_v8, 0.0  ;;  %v29_v14 = vsel %vm23_vm0, %v18_v3, 0.0  ;;  %v36_v16 = vsel %vm23_vm0, %v21_v10, 0.0 }
   0x5   :  { %v35_v15 = vadd.f32 %v34_v13, %v33_v12 }
   0x6   :  { %8 = vsyncpa [#allocation3], 0  ;;  %v28_v17 = vadd.f32 %v27_v7, %v26_v9  ;;  %v38_v19 = vsel %vm23_vm0, %v22_v11, 0.0  ;;  %v245_v22 = vld [vmem:[%s370_s2] ss:$0 sm:$0xff]  ;;  %v279_v24 = vmov 0.0   ;;  %v150_v48 = vlaneseq }
   0x7   :  { %v37_v18 = vadd.f32 %v36_v16, %v35_v15  ;;  %v280_v60 = vmov 1983009808   ;;  %vm175_vm3 = vcmask 1041408   ;;  %vm224_vm4 = vcmask 1041409  }
   0x8   :  { %v30_v20 = vadd.f32 %v29_v14, %v28_v17  ;;  %v148_v61 = vunpack.c.l.s4 %v280_v60  ;;  %v144_v14 = vld [vmem:[%s369_s1] sm:$0xff]  ;;  %s282_s1 = smov [#allocation2]   ;;  %vm227_vm5 = vcmask 9216  }
   0x9   :  { %v39_v21 = vadd.f32 %v38_v19, %v37_v18  ;;  %s235_s30 = sshll.u32 %s282_s1, 4  ;;  %s236_s30 = int_to_ptr.vmem [resolvable:$true] %s235_s30 }
   0xa   :  { %31 = vadd.xlane.f32.xlu0 %v30_v20  ;;  %s257_s4 = scalar_lea.vmem %s236_s30, 32  ;;  %p262_p1 = scmp.lt.s32.totalorder %s236_s30, %s236_s30 }
   0xb   :  { %p258_p0 = scmp.ne.s32.totalorder %s236_s30, %s257_s4  ;;  %p263_p2 = scmp.lt.s32.totalorder %s257_s4, %s257_s4 }
   0xd   :  { %p264_p3 = por %p263_p2, %p262_p1 }
   0xe   :  { %40 = vadd.xlane.f32.xlu0 %v39_v21 }
   0xf   :  { %p265_p4 = pnand %p264_p3, %p258_p0 }
  0x24   :  { %201 = vbcast.lane.b32.xlu0 %v245_v22, 256 }
  0x93   :  { %v32_v23 = vpop.xlane.xlu0 %31 }
  0x94   :  { %vm42_vm1 = vcmp.ne.f32.partialorder %v32_v23, 0.0 }
  0x95   :  { %v243_v25 = vsel %vm42_vm1, 1.0, %v279_v24 }
  0x96   :  { %v48_v26 = vsel %vm23_vm0, %v243_v25, 0.0  ;;  %v62_v27 = vmul.f32 %v243_v25, %v15_v0  ;;  %v63_v28 = vmul.f32 %v243_v25, %v16_v1  ;;  %v64_v29 = vmul.f32 %v243_v25, %v17_v2 }
  0x97   :  { %v49_v30 = vrot.slane %v48_v26, 4  ;;  %v65_v31 = vmul.f32 %v243_v25, %v18_v3  ;;  %v41_v32 = vpop.xlane.xlu0 %40 }
  0x98   :  { %v70_v33 = vsel %vm23_vm0, %v62_v27, 0.0  ;;  %v77_v34 = vsel %vm23_vm0, %v63_v28, 0.0  ;;  %v84_v35 = vsel %vm23_vm0, %v64_v29, 0.0  ;;  %vm43_vm2 = vcmp.ne.f32.partialorder %v41_v32, 0.0 }
  0x99   :  { %v50_v36 = vadd.f32 %v49_v30, %v48_v26  ;;  %v71_v37 = vrot.slane %v70_v33, 4  ;;  %v244_v38 = vsel %vm43_vm2, 1.0, %v279_v24  ;;  %v78_v40 = vrot.slane %v77_v34, 4 }
  0x9a   :  { %v85_v41 = vrot.slane %v84_v35, 4  ;;  %v91_v42 = vsel %vm23_vm0, %v65_v31, 0.0  ;;  %v55_v43 = vsel %vm23_vm0, %v244_v38, 0.0  ;;  %v66_v44 = vmul.f32 %v244_v38, %v19_v4 }
  0x9b   :  { %v51_v39 = vrot.slane %v50_v36, 2  ;;  %v67_v45 = vmul.f32 %v244_v38, %v20_v8  ;;  %v72_v47 = vadd.f32 %v71_v37, %v70_v33  ;;  %v92_v49 = vrot.slane %v91_v42, 4 }
  0x9c   :  { %v56_v50 = vrot.slane %v55_v43, 4  ;;  %v68_v51 = vmul.f32 %v244_v38, %v21_v10  ;;  %v69_v52 = vmul.f32 %v244_v38, %v22_v11  ;;  %v79_v54 = vadd.f32 %v78_v40, %v77_v34 }
  0x9d   :  { %v52_v46 = vadd.f32 %v51_v39, %v50_v36  ;;  %v86_v55 = vadd.f32 %v85_v41, %v84_v35  ;;  %v98_v56 = vsel %vm23_vm0, %v66_v44, 0.0  ;;  %v105_v58 = vsel %vm23_vm0, %v67_v45, 0.0 }
  0x9e   :  { %v57_v57 = vadd.f32 %v56_v50, %v55_v43  ;;  %v112_v59 = vsel %vm23_vm0, %v68_v51, 0.0  ;;  %v99_v63 = vrot.slane %v98_v56, 4  ;;  %v106_v0 = vrot.slane %v105_v58, 4 }
  0x9f   :  { %v53_v53 = vrot.slane %v52_v46, 1  ;;  %v119_v1 = vsel %vm23_vm0, %v69_v52, 0.0  ;;  %v93_v2 = vadd.f32 %v92_v49, %v91_v42  ;;  %v113_v4 = vrot.slane %v112_v59, 4 }
  0xa0   :  { %v58_v3 = vrot.slane %v57_v57, 2  ;;  %v120_v5 = vrot.slane %v119_v1, 4  ;;  %v73_v6 = vrot.slane %v72_v47, 2  ;;  %v80_v7 = vrot.slane %v79_v54, 2 }
  0xa1   :  { %v54_v62 = vadd.f32 %v53_v53, %v52_v46  ;;  %v87_v8 = vrot.slane %v86_v55, 2  ;;  %v149_v10 = vunpack.c.0.s8 %v148_v61  ;;  %v349_v11 = vshrl.u32 %v150_v48, 7 }
  0xa2   :  { %v59_v9 = vadd.f32 %v58_v3, %v57_v57  ;;  %v100_v12 = vadd.f32 %v99_v63, %v98_v56  ;;  %v107_v13 = vadd.f32 %v106_v0, %v105_v58  ;;  %v114_v16 = vadd.f32 %v113_v4, %v112_v59 }
  0xa3   :  { %253 = vrcp.f32 %v54_v62  ;;  %v121_v17 = vadd.f32 %v120_v5, %v119_v1  ;;  %v94_v18 = vrot.slane %v93_v2, 2  ;;  %v74_v19 = vadd.f32 %v73_v6, %v72_v47 }
  0xa4   :  { %v60_v15 = vrot.slane %v59_v9, 1  ;;  %v81_v20 = vadd.f32 %v80_v7, %v79_v54  ;;  %v88_v21 = vadd.f32 %v87_v8, %v86_v55  ;;  %v146_v24 = vcombine.high %v144_v14, %v144_v14 }
  0xa5   :  { %v95_v23 = vadd.f32 %v94_v18, %v93_v2  ;;  %v152_v25 = vsub.s32 %v149_v10, %v349_v11  ;;  %v101_v26 = vrot.slane %v100_v12, 2  ;;  %v108_v27 = vrot.slane %v107_v13, 2 }
  0xa6   :  { %v61_v22 = vadd.f32 %v60_v15, %v59_v9  ;;  %v115_v28 = vrot.slane %v114_v16, 2  ;;  %v122_v29 = vrot.slane %v121_v17, 2  ;;  %v75_v30 = vrot.slane %v74_v19, 1 }
  0xa7   :  { %v82_v31 = vrot.slane %v81_v20, 1  ;;  %v89_v32 = vrot.slane %v88_v21, 1  ;;  %v96_v33 = vrot.slane %v95_v23, 1  ;;  %v153_v34 = vrot.slane %v144_v14, %v152_v25 }
  0xa8   :  { %255 = vrcp.f32 %v61_v22  ;;  %v160_v35 = vrot.slane %v146_v24, %v152_v25  ;;  %v102_v36 = vadd.f32 %v101_v26, %v100_v12  ;;  %v109_v37 = vadd.f32 %v108_v27, %v107_v13 }
  0xa9   :  { %v116_v38 = vadd.f32 %v115_v28, %v114_v16  ;;  %v123_v39 = vadd.f32 %v122_v29, %v121_v17  ;;  %v76_v40 = vadd.f32 %v75_v30, %v74_v19  ;;  %v83_v41 = vadd.f32 %v82_v31, %v81_v20 }
  0xaa   :  { %v90_v42 = vadd.f32 %v89_v32, %v88_v21  ;;  %v97_v43 = vadd.f32 %v96_v33, %v95_v23  ;;  %v161_v45 = vcombine.high %v153_v34, %v153_v34  ;;  %v162_v46 = vcombine.high %v160_v35, %v160_v35  ;;  %v202_v33 = vpop.permute.xlu0 %201 }
  0xab   :  { %v103_v52 = vrot.slane %v102_v36, 1  ;;  %v110_v53 = vrot.slane %v109_v37, 1  ;;  %v117_v54 = vrot.slane %v116_v38, 1  ;;  %v124_v55 = vrot.slane %v123_v39, 1 }
  0xac   :  { %v281_v32 = vmov 0  }
  0xad   :  { %v104_v63 = vadd.f32 %v103_v52, %v102_v36  ;;  %v111_v0 = vadd.f32 %v110_v53, %v109_v37  ;;  %v118_v1 = vadd.f32 %v117_v54, %v116_v38  ;;  %v125_v6 = vadd.f32 %v124_v55, %v123_v39  ;;  %250 = vset.pattern.permute.xlu1 %v281_v32 }
  0xae   :  { %251 = vset.pattern.permute.xlu0 %v281_v32  ;;  %v215_v38 = vand.u32 127, %v150_v48 }
  0xb0   :  { %v254_v44 = vpop.eup %253 }
  0xb1   :  { %v127_v47 = vmul.f32 %v254_v44, %v76_v40  ;;  %v128_v49 = vmul.f32 %v254_v44, %v83_v41  ;;  %v129_v50 = vmul.f32 %v254_v44, %v90_v42  ;;  %v130_v51 = vmul.f32 %v254_v44, %v97_v43 }
  0xb2   :  { %v218_v40 = vsub.s32 %v215_v38, %v349_v11 }
  0xb3   :  { %v136_v56 = vmax.f32 %v127_v47, 0.0  ;;  %v137_v57 = vmax.f32 %v128_v49, 0.0  ;;  %v138_v58 = vmax.f32 %v129_v50, 0.0  ;;  %v139_v59 = vmax.f32 %v130_v51, 0.0 }
  0xb5   :  { %v167_v60 = vmul.f32 %v153_v34, %v136_v56  ;;  %v168_v61 = vmul.f32 %v161_v45, %v137_v57  ;;  %v169_v62 = vmul.f32 %v160_v35, %v138_v58  ;;  %v256_v2 = vpop.eup %255  ;;  %v170_v3 = vmul.f32 %v162_v46, %v139_v59 }
  0xb6   :  { %v132_v8 = vmul.f32 %v256_v2, %v104_v63  ;;  %v133_v9 = vmul.f32 %v256_v2, %v111_v0  ;;  %v134_v10 = vmul.f32 %v256_v2, %v118_v1  ;;  %v135_v13 = vmul.f32 %v256_v2, %v125_v6 }
  0xb7   :  { %v176_v4 = vsel %vm175_vm3, %v167_v60, 0.0  ;;  %v177_v5 = vsel %vm175_vm3, %v168_v61, 0.0  ;;  %v179_v12 = vsel %vm175_vm3, %v169_v62, 0.0  ;;  %v181_v18 = vsel %vm175_vm3, %v170_v3, 0.0 }
  0xb8   :  { %v178_v7 = vadd.f32 %v177_v5, %v176_v4  ;;  %v140_v15 = vmax.f32 %v132_v8, 0.0  ;;  %v141_v16 = vmax.f32 %v133_v9, 0.0  ;;  %v142_v17 = vmax.f32 %v134_v10, 0.0 }
  0xb9   :  { %v143_v19 = vmax.f32 %v135_v13, 0.0 }
  0xba   :  { %v180_v14 = vadd.f32 %v179_v12, %v178_v7  ;;  %v171_v21 = vmul.f32 %v153_v34, %v140_v15  ;;  %v172_v22 = vmul.f32 %v161_v45, %v141_v16  ;;  %v173_v23 = vmul.f32 %v160_v35, %v142_v17 }
  0xbb   :  { %v174_v24 = vmul.f32 %v162_v46, %v143_v19 }
  0xbc   :  { %v182_v20 = vadd.f32 %v181_v18, %v180_v14  ;;  %v185_v25 = vsel %vm175_vm3, %v171_v21, 0.0  ;;  %v186_v26 = vsel %vm175_vm3, %v172_v22, 0.0  ;;  %v188_v28 = vsel %vm175_vm3, %v173_v23, 0.0 }
  0xbd   :  { %v187_v27 = vadd.f32 %v186_v26, %v185_v25  ;;  %v190_v30 = vsel %vm175_vm3, %v174_v24, 0.0 }
  0xbe   :  { %183 = vadd.xlane.f32.xlu1 %v182_v20 }
  0xbf   :  { %v189_v29 = vadd.f32 %v188_v28, %v187_v27 }
  0xc1   :  { %v191_v31 = vadd.f32 %v190_v30, %v189_v29 }
  0xc3   :  { %192 = vadd.xlane.f32.xlu1 %v191_v31 }
 0x147   :  { %v184_v34 = vpop.xlane.xlu1 %183 }
 0x148   :  { %v204_v35 = vadd.f32 %v202_v33, %v184_v34 }
 0x14a   :  { %209 = vperm.xlu1 %250, %v204_v35  }
 0x14c   :  { %v193_v36 = vpop.xlane.xlu1 %192 }
 0x14d   :  { %v205_v37 = vadd.f32 %v202_v33, %v193_v36 }
 0x14f   :  { %212 = vperm.xlu1 %250, %v205_v37  }
 0x1c5   :  { %v210_v39 = vpop.permute.xlu1 %209 }
 0x1c6   :  { %v219_v42 = vrot.slane %v210_v39, %v218_v40 }
 0x1ca   :  { %v213_v41 = vpop.permute.xlu1 %212 }
 0x1cb   :  { %v223_v43 = vrot.slane %v213_v41, %v218_v40 }
 0x1cd   :  { %v225_v44 = vsel %vm224_vm4, %v223_v43, %v219_v42 }
 0x1ce   :  { %228 = vst.msk [vmem:[#allocation2] sm:$0x3] %vm227_vm5, %v225_v44 }
 0x1cf   :  { %268 = shalt.err (!%p265_p4)
}
 0x1d0   :  { %238 = dma.vmem_to_hbm [thread:$0]  %s236_s30, 32, %s371_s3, [#allocation3]  }
 0x1d1   :  { %277 = dma.done.wait [#allocation3], 32  }
 0x1d2   :  { %278 = vsyncadd [#allocation3], 4294967264 }
 0x1d3   :  { %242 = vsyncpa [#allocation3], 1 }

</bundles_post_ra>
